<compile_context>
chip_gen: v5e
topology: v5e:2x2
jax: 0.10.0
libtpu: 0.0.40
codegen_flags: <defaults>
</compile_context>

<pallas_src>
import functools

import jax
import jax.numpy as jnp
from jax import lax
from jax.experimental import pallas as pl
from jax.experimental.pallas import tpu as pltpu


def _round_up(x, m):
    return (x + m - 1) // m * m


def rnn_recurrence_kernel(xp_ref, whh_ref, h_ref, *, t_total, needs_mask, unroll):
    """One grid step processes TB timesteps of the serial recurrence.

    xp_ref : (TB, Bb, Hp)  precomputed x @ W_ih^T + bias, time-major (compute dtype)
    whh_ref: (Hp, Hp)      W_hh^T (compute dtype), loop-invariant
    h_ref  : (Bb, Hp)      resident output block, doubles as hidden-state carry (f32)
    """
    t = pl.program_id(1)          # time-block index (serial axis)
    tb = xp_ref.shape[0]          # static

    @pl.when(t == 0)
    def _():
        h_ref[...] = jnp.zeros_like(h_ref)      # h_0 = 0 (per batch block)

    whh = whh_ref[...]
    base = t * tb                 # global timestep offset of this block

    def step(s, h):
        # Hidden state stays fp32; only the MXU operands use the compute dtype.
        pre = xp_ref[s].astype(jnp.float32) + jnp.dot(
            h.astype(whh.dtype), whh, preferred_element_type=jnp.float32
        )
        h_new = jnp.tanh(pre)
        if needs_mask:
            # Padded tail timesteps (T rounded up to a multiple of TB) are no-ops.
            h_new = jnp.where(base + s < t_total, h_new, h)
        return h_new

    h_ref[...] = lax.fori_loop(0, tb, step, h_ref[...], unroll=unroll)


def recurrent_model_forward(
    x,
    params,
    compute_dtype=jnp.bfloat16,
    max_time_block=32,
    vmem_budget_bytes=48 * 1024 * 1024,   # conservative: fits v7x's 64 MiB VMEM
):
    """Pallas equivalent of Recurrent_model.forward.

    x: (B, T, I) float32; returns (B, O) float32.
    """
    B, T, I = x.shape
    H = params["w_ih"].shape[0]

    cdt = jnp.dtype(compute_dtype)
    # Sublane packing: 8 rows for 32-bit, 16 for bf16 -> dense, unmasked vregs.
    sub = 8 * (4 // cdt.itemsize)
    Bp = _round_up(B, sub)
    Hp = _round_up(H, 128)

    # v7x megacore: shard batch rows across the two TensorCores when big enough.
    n_bblk = 2 if (Bp >= 256 and Bp % (2 * sub) == 0) else 1
    Bb = Bp // n_bblk

    # Budget-derived time block: 2x xp stream buffers + W_hh (double-buffered by the
    # pipeline) + resident h must fit the VMEM budget.
    fixed_bytes = 2 * Hp * Hp * cdt.itemsize + 2 * Bb * Hp * 4
    per_step_bytes = 2 * Bb * Hp * cdt.itemsize
    tb_budget = max(1, (vmem_budget_bytes - fixed_bytes) // per_step_bytes)
    TB = max(1, min(T, max_time_block, tb_budget))
    n_tblk = pl.cdiv(T, TB)
    Tp = n_tblk * TB

    # ---- hoisted input projection: one big batched matmul, emitted time-major ----
    w_ih_p = jnp.pad(params["w_ih"], ((0, Hp - H), (0, 0)))            # (Hp, I)
    bias_p = jnp.pad(params["b_ih"] + params["b_hh"], (0, Hp - H))     # (Hp,)
    xp = jnp.einsum(
        "bti,hi->tbh",
        x.astype(compute_dtype),
        w_ih_p.astype(compute_dtype),
        preferred_element_type=jnp.float32,
    ) + bias_p[None, None, :]                                          # (T, B, Hp) f32
    xp = xp.astype(compute_dtype)
    xp = jnp.pad(xp, ((0, Tp - T), (0, Bp - B), (0, 0)))               # (Tp, Bp, Hp)

    # Recurrent weight, transposed + zero-padded: padded hidden lanes stay exactly
    # zero through the whole recurrence, so padding never changes the result.
    w_hh_p = jnp.pad(params["w_hh"], ((0, Hp - H), (0, Hp - H))).T.astype(compute_dtype)

    cost = pl.CostEstimate(
        flops=2 * Tp * Bp * Hp * Hp,
        transcendentals=Tp * Bp * Hp,
        bytes_accessed=Tp * Bp * Hp * cdt.itemsize
        + Hp * Hp * cdt.itemsize
        + Bp * Hp * 4,
    )
    vmem_limit = int(
        min(max(fixed_bytes + per_step_bytes * TB + (4 << 20), 32 << 20), 48 << 20)
    )

    kernel = functools.partial(
        rnn_recurrence_kernel,
        t_total=T,
        needs_mask=(Tp != T),
        unroll=int(min(TB, 8)),
    )

    h_last = pl.pallas_call(
        kernel,
        out_shape=jax.ShapeDtypeStruct((Bp, Hp), jnp.float32),
        grid_spec=pltpu.PrefetchScalarGridSpec(
            num_scalar_prefetch=0,
            grid=(n_bblk, n_tblk),
            in_specs=[
                # TB timesteps of the precomputed projection per grid step.
                pl.BlockSpec((TB, Bb, Hp), lambda b, t: (t, b, 0)),
                # Loop-invariant weight: constant index_map -> fetched once.
                pl.BlockSpec((Hp, Hp), lambda b, t: (0, 0)),
            ],
            # Constant-over-time output index_map -> resident lane-dense block used
            # as the hidden-state carry; one block per batch shard.
            out_specs=pl.BlockSpec((Bb, Hp), lambda b, t: (b, 0)),
        ),
        compiler_params=pltpu.CompilerParams(
            # Batch blocks are independent (megacore-parallel); time is a true
            # serial recurrence.
            dimension_semantics=("parallel", "arbitrary"),
            vmem_limit_bytes=vmem_limit,
        ),
        cost_estimate=cost,
    )(xp, w_hh_p)

    # Final FC runs exactly once on h_T -> plain XLA matmul in fp32 (keeps W_fc /
    # b_fc out of VMEM for the duration of the recurrence).
    h_last = h_last[:B, :H]
    return h_last @ params["w_fc"].T + params["b_fc"]


def reference_forward(x, params):
    """Pure-JAX reference matching torch.nn.RNN(batch_first=True) + Linear."""
    B = x.shape[0]
    H = params["w_ih"].shape[0]
    h0 = jnp.zeros((B, H), jnp.float32)

    def step(h, x_t):
        h_new = jnp.tanh(
            x_t @ params["w_ih"].T + params["b_ih"]
            + h @ params["w_hh"].T + params["b_hh"]
        )
        return h_new, h_new

    h_last, _ = jax.lax.scan(step, h0, jnp.transpose(x, (1, 0, 2)))
    return h_last @ params["w_fc"].T + params["b_fc"]


def init_params(key, input_size, hidden_size, output_size):
    """Deterministic uniform init (same scheme as PyTorch defaults)."""
    ks = jax.random.split(key, 6)
    k_rnn = 1.0 / jnp.sqrt(hidden_size)
    k_fc = 1.0 / jnp.sqrt(hidden_size)
    u = lambda k, shape, bound: jax.random.uniform(
        k, shape, jnp.float32, -bound, bound
    )
    return {
        "w_ih": u(ks[0], (hidden_size, input_size), k_rnn),
        "w_hh": u(ks[1], (hidden_size, hidden_size), k_rnn),
        "b_ih": u(ks[2], (hidden_size,), k_rnn),
        "b_hh": u(ks[3], (hidden_size,), k_rnn),
        "w_fc": u(ks[4], (output_size, hidden_size), k_fc),
        "b_fc": u(ks[5], (output_size,), k_fc),
    }


if __name__ == "__main__":
    B, T, I, H, O = 2, 8, 16, 32, 8

    key = jax.random.PRNGKey(0)
    k_x, k_p = jax.random.split(key)
    x = jax.random.normal(k_x, (B, T, I), jnp.float32)
    params = init_params(k_p, I, H, O)

    ref = jax.block_until_ready(reference_forward(x, params))

    # Full-precision path: must match the PyTorch-equivalent reference tightly.
    out_f32 = jax.block_until_ready(
        recurrent_model_forward(x, params, compute_dtype=jnp.float32)
    )
    assert out_f32.shape == (B, O)
    assert jnp.allclose(out_f32, ref, atol=1e-5, rtol=1e-5), (
        f"f32 max abs err {float(jnp.max(jnp.abs(out_f32 - ref)))}"
    )

    # Non-divisor T exercises the masked-tail path (TB=4, Tp=8 > T=7).
    T_odd = 7
    x_odd = jax.random.normal(jax.random.PRNGKey(1), (B, T_odd, I), jnp.float32)
    ref_odd = jax.block_until_ready(reference_forward(x_odd, params))
    out_odd = jax.block_until_ready(
        recurrent_model_forward(
            x_odd, params, compute_dtype=jnp.float32, max_time_block=4
        )
    )
    assert jnp.allclose(out_odd, ref_odd, atol=1e-5, rtol=1e-5), (
        f"masked-tail max abs err {float(jnp.max(jnp.abs(out_odd - ref_odd)))}"
    )

    # bf16 MXU-operand path is the production default on TPU; some non-TPU
    # (interpret/CPU) backends cannot execute bf16 dots, so only run it on TPU.
    if jax.default_backend() == "tpu":
        out_bf16 = jax.block_until_ready(recurrent_model_forward(x, params))
        assert out_bf16.shape == (B, O)
        assert jnp.allclose(out_bf16, ref, atol=5e-2, rtol=5e-2), (
            f"bf16 max abs err {float(jnp.max(jnp.abs(out_bf16 - ref)))}"
        )

    print("KERNEL_OK")
</pallas_src>

<mosaic_0001>
module attributes {stable_mosaic.version = 11 : i64} {
  func.func @rnn_recurrence_kernel(%arg0: i32, %arg1: i32, %arg2: memref<8x8x128xf32, #tpu.memory_space<vmem>>, %arg3: memref<128x128xf32, #tpu.memory_space<vmem>>, %arg4: memref<8x128xf32, #tpu.memory_space<vmem>>) attributes {dimension_semantics = [#tpu.dimension_semantics<parallel>, #tpu.dimension_semantics<arbitrary>], iteration_bounds = array<i64: 1, 1>, scalar_prefetch = 0 : i64, scratch_operands = 0 : i64, tpu.core_type = #tpu.core_type<tc>, window_params = [{transform_indices = @transform_0, window_bounds = array<i64: 8, 8, 128>}, {pipeline_mode = #tpu.pipeline_mode<synchronous>, transform_indices = @transform_1, window_bounds = array<i64: 128, 128>}, {transform_indices = @transform_2, window_bounds = array<i64: 8, 128>}]} {
    %c0_i32 = arith.constant 0 : i32
    %0 = arith.cmpi eq, %arg1, %c0_i32 : i32
    %1 = arith.extui %0 : i1 to i32
    %c0_i32_0 = arith.constant 0 : i32
    %2 = arith.cmpi ne, %1, %c0_i32_0 : i32
    scf.if %2 {
      %cst_30 = arith.constant 0.000000e+00 : f32
      %54 = vector.broadcast %cst_30 : f32 to vector<8x128xf32>
      %c0_31 = arith.constant 0 : index
      %c0_32 = arith.constant 0 : index
      %55 = vector.load %arg4[%c0_31, %c0_32] : memref<8x128xf32, #tpu.memory_space<vmem>>, vector<8x128xf32>
      tpu.vector_store %arg4[%c0_31, %c0_32], %54 {strides = array<i32>} : memref<8x128xf32, #tpu.memory_space<vmem>>, vector<8x128xf32>,
    } else {
    }
    %c0 = arith.constant 0 : index
    %c0_1 = arith.constant 0 : index
    %3 = vector.load %arg3[%c0, %c0_1] : memref<128x128xf32, #tpu.memory_space<vmem>>, vector<128x128xf32>
    %c0_2 = arith.constant 0 : index
    %c0_3 = arith.constant 0 : index
    %4 = vector.load %arg4[%c0_2, %c0_3] : memref<8x128xf32, #tpu.memory_space<vmem>>, vector<8x128xf32>
    %c0_i32_4 = arith.constant 0 : i32
    %5 = arith.index_cast %c0_i32_4 : i32 to index
    %c0_5 = arith.constant 0 : index
    %c0_6 = arith.constant 0 : index
    %6 = vector.load %arg2[%5, %c0_5, %c0_6] : memref<8x8x128xf32, #tpu.memory_space<vmem>>, vector<1x8x128xf32>
    %7 = vector.shape_cast %6 : vector<1x8x128xf32> to vector<8x128xf32>
    %cst = arith.constant dense<0.000000e+00> : vector<8x128xf32>
    %8 = tpu.matmul %4, %3, %cst {dimension_numbers = #tpu.dot_dimension_numbers<[1], [0], [0], [1], [0, 0, 1, 1], [], []>} : vector<8x128xf32>, vector<128x128xf32>, vector<8x128xf32> -> vector<8x128xf32>
    %9 = arith.addf %7, %8 : vector<8x128xf32>
    %10 = math.tanh %9 : vector<8x128xf32>
    %c1_i32 = arith.constant 1 : i32
    %11 = arith.index_cast %c1_i32 : i32 to index
    %c0_7 = arith.constant 0 : index
    %c0_8 = arith.constant 0 : index
    %12 = vector.load %arg2[%11, %c0_7, %c0_8] : memref<8x8x128xf32, #tpu.memory_space<vmem>>, vector<1x8x128xf32>
    %13 = vector.shape_cast %12 : vector<1x8x128xf32> to vector<8x128xf32>
    %cst_9 = arith.constant dense<0.000000e+00> : vector<8x128xf32>
    %14 = tpu.matmul %10, %3, %cst_9 {dimension_numbers = #tpu.dot_dimension_numbers<[1], [0], [0], [1], [0, 0, 1, 1], [], []>} : vector<8x128xf32>, vector<128x128xf32>, vector<8x128xf32> -> vector<8x128xf32>
    %15 = arith.addf %13, %14 : vector<8x128xf32>
    %16 = math.tanh %15 : vector<8x128xf32>
    %c2_i32 = arith.constant 2 : i32
    %17 = arith.index_cast %c2_i32 : i32 to index
    %c0_10 = arith.constant 0 : index
    %c0_11 = arith.constant 0 : index
    %18 = vector.load %arg2[%17, %c0_10, %c0_11] : memref<8x8x128xf32, #tpu.memory_space<vmem>>, vector<1x8x128xf32>
    %19 = vector.shape_cast %18 : vector<1x8x128xf32> to vector<8x128xf32>
    %cst_12 = arith.constant dense<0.000000e+00> : vector<8x128xf32>
    %20 = tpu.matmul %16, %3, %cst_12 {dimension_numbers = #tpu.dot_dimension_numbers<[1], [0], [0], [1], [0, 0, 1, 1], [], []>} : vector<8x128xf32>, vector<128x128xf32>, vector<8x128xf32> -> vector<8x128xf32>
    %21 = arith.addf %19, %20 : vector<8x128xf32>
    %22 = math.tanh %21 : vector<8x128xf32>
    %c3_i32 = arith.constant 3 : i32
    %23 = arith.index_cast %c3_i32 : i32 to index
    %c0_13 = arith.constant 0 : index
    %c0_14 = arith.constant 0 : index
    %24 = vector.load %arg2[%23, %c0_13, %c0_14] : memref<8x8x128xf32, #tpu.memory_space<vmem>>, vector<1x8x128xf32>
    %25 = vector.shape_cast %24 : vector<1x8x128xf32> to vector<8x128xf32>
    %cst_15 = arith.constant dense<0.000000e+00> : vector<8x128xf32>
    %26 = tpu.matmul %22, %3, %cst_15 {dimension_numbers = #tpu.dot_dimension_numbers<[1], [0], [0], [1], [0, 0, 1, 1], [], []>} : vector<8x128xf32>, vector<128x128xf32>, vector<8x128xf32> -> vector<8x128xf32>
    %27 = arith.addf %25, %26 : vector<8x128xf32>
    %28 = math.tanh %27 : vector<8x128xf32>
    %c4_i32 = arith.constant 4 : i32
    %29 = arith.index_cast %c4_i32 : i32 to index
    %c0_16 = arith.constant 0 : index
    %c0_17 = arith.constant 0 : index
    %30 = vector.load %arg2[%29, %c0_16, %c0_17] : memref<8x8x128xf32, #tpu.memory_space<vmem>>, vector<1x8x128xf32>
    %31 = vector.shape_cast %30 : vector<1x8x128xf32> to vector<8x128xf32>
    %cst_18 = arith.constant dense<0.000000e+00> : vector<8x128xf32>
    %32 = tpu.matmul %28, %3, %cst_18 {dimension_numbers = #tpu.dot_dimension_numbers<[1], [0], [0], [1], [0, 0, 1, 1], [], []>} : vector<8x128xf32>, vector<128x128xf32>, vector<8x128xf32> -> vector<8x128xf32>
    %33 = arith.addf %31, %32 : vector<8x128xf32>
    %34 = math.tanh %33 : vector<8x128xf32>
    %c5_i32 = arith.constant 5 : i32
    %35 = arith.index_cast %c5_i32 : i32 to index
    %c0_19 = arith.constant 0 : index
    %c0_20 = arith.constant 0 : index
    %36 = vector.load %arg2[%35, %c0_19, %c0_20] : memref<8x8x128xf32, #tpu.memory_space<vmem>>, vector<1x8x128xf32>
    %37 = vector.shape_cast %36 : vector<1x8x128xf32> to vector<8x128xf32>
    %cst_21 = arith.constant dense<0.000000e+00> : vector<8x128xf32>
    %38 = tpu.matmul %34, %3, %cst_21 {dimension_numbers = #tpu.dot_dimension_numbers<[1], [0], [0], [1], [0, 0, 1, 1], [], []>} : vector<8x128xf32>, vector<128x128xf32>, vector<8x128xf32> -> vector<8x128xf32>
    %39 = arith.addf %37, %38 : vector<8x128xf32>
    %40 = math.tanh %39 : vector<8x128xf32>
    %c6_i32 = arith.constant 6 : i32
    %41 = arith.index_cast %c6_i32 : i32 to index
    %c0_22 = arith.constant 0 : index
    %c0_23 = arith.constant 0 : index
    %42 = vector.load %arg2[%41, %c0_22, %c0_23] : memref<8x8x128xf32, #tpu.memory_space<vmem>>, vector<1x8x128xf32>
    %43 = vector.shape_cast %42 : vector<1x8x128xf32> to vector<8x128xf32>
    %cst_24 = arith.constant dense<0.000000e+00> : vector<8x128xf32>
    %44 = tpu.matmul %40, %3, %cst_24 {dimension_numbers = #tpu.dot_dimension_numbers<[1], [0], [0], [1], [0, 0, 1, 1], [], []>} : vector<8x128xf32>, vector<128x128xf32>, vector<8x128xf32> -> vector<8x128xf32>
    %45 = arith.addf %43, %44 : vector<8x128xf32>
    %46 = math.tanh %45 : vector<8x128xf32>
    %c7_i32 = arith.constant 7 : i32
    %47 = arith.index_cast %c7_i32 : i32 to index
    %c0_25 = arith.constant 0 : index
    %c0_26 = arith.constant 0 : index
    %48 = vector.load %arg2[%47, %c0_25, %c0_26] : memref<8x8x128xf32, #tpu.memory_space<vmem>>, vector<1x8x128xf32>
    %49 = vector.shape_cast %48 : vector<1x8x128xf32> to vector<8x128xf32>
    %cst_27 = arith.constant dense<0.000000e+00> : vector<8x128xf32>
    %50 = tpu.matmul %46, %3, %cst_27 {dimension_numbers = #tpu.dot_dimension_numbers<[1], [0], [0], [1], [0, 0, 1, 1], [], []>} : vector<8x128xf32>, vector<128x128xf32>, vector<8x128xf32> -> vector<8x128xf32>
    %51 = arith.addf %49, %50 : vector<8x128xf32>
    %52 = math.tanh %51 : vector<8x128xf32>
    %c8_i32 = arith.constant 8 : i32
    %c0_28 = arith.constant 0 : index
    %c0_29 = arith.constant 0 : index
    %53 = vector.load %arg4[%c0_28, %c0_29] : memref<8x128xf32, #tpu.memory_space<vmem>>, vector<8x128xf32>
    tpu.vector_store %arg4[%c0_28, %c0_29], %52 {strides = array<i32>} : memref<8x128xf32, #tpu.memory_space<vmem>>, vector<8x128xf32>,
    return
  }
  func.func @transform_0(%arg0: i32, %arg1: i32) -> (i32, i32, i32) {
    %c0_i32 = arith.constant 0 : i32
    %c0_i32_0 = arith.constant 0 : i32
    return %arg1, %arg0, %c0_i32 : i32, i32, i32
  }
  func.func @transform_1(%arg0: i32, %arg1: i32) -> (i32, i32) {
    %c0_i32 = arith.constant 0 : i32
    %c0_i32_0 = arith.constant 0 : i32
    %c0_i32_1 = arith.constant 0 : i32
    return %c0_i32, %c0_i32_0 : i32, i32
  }
  func.func @transform_2(%arg0: i32, %arg1: i32) -> (i32, i32) {
    %c0_i32 = arith.constant 0 : i32
    %c0_i32_0 = arith.constant 0 : i32
    return %arg0, %c0_i32 : i32, i32
  }
}

</mosaic_0001>

<bundles_post_ra>
// kernel: tpu_custom_call.1
= control target key start
LH: loop header
LB: loop body
LE: loop exit
PB: predicated region body
PF: predicated region fallthrough
CT: control target
= control target key end

     0   :  { %7 = vsyncpa [#allocation3], 0  ;;  %s566_s0 = inlined_call_operand.hbm [shape: f32[8,8,128], index: 0, kind: input, shape index: {}]   ;;  %s567_s1 = inlined_call_operand.hbm [shape: f32[128,128], index: 1, kind: input, shape index: {}]   ;;  %s568_s2 = inlined_call_operand.hbm [shape: f32[8,128], index: 2, kind: output, shape index: {}]  }
   0x1   :  { %8 = vsyncpa [#allocation6], 0 }
   0x2   :  { %9 = vsyncpa [#allocation4], 0  ;;  %s14_s11 = sshll.u32 %s566_s0, 4  ;;  %s376_s12 = smov [#allocation2]   ;;  %s15_s11 = int_to_ptr.hbm [resolvable:$true] %s14_s11 }
   0x3   :  { %s16_s13 = sshll.u32 %s376_s12, 4  ;;  %s27_s16 = sshll.u32 %s567_s1, 4  ;;  %s17_s13 = int_to_ptr.vmem [resolvable:$true] %s16_s13  ;;  %s28_s16 = int_to_ptr.hbm [resolvable:$true] %s27_s16 }
   0x4   :  { %s377_s17 = smov 128   ;;  %s378_s18 = smov 8  }
   0x5   :  { %22 = dma.hbm_to_vmem [thread:$0]  %s15_s11, 1024, %s17_s13, [#allocation3], %s377_s17, %s377_s17, %s378_s18  }
   0x6   :  { %s379_s19 = smov [#allocation5]  }
   0x7   :  { %s29_s20 = sshll.u32 %s379_s19, 4  ;;  %s30_s20 = int_to_ptr.vmem [resolvable:$true] %s29_s20 }
   0x8   :  { %35 = dma.hbm_to_vmem [thread:$0]  %s28_s16, 2048, %s30_s20, [#allocation6], %s377_s17, %s377_s17, %s378_s18  }
   0x9   :  { %370 = dma.done.wait [#allocation3], 1024  }
   0xa   :  { %371 = vsyncadd [#allocation3], 4294966272 }
   0xb   :  { %372 = dma.done.wait [#allocation6], 2048  }
   0xc   :  { %373 = vsyncadd [#allocation6], 4294965248  ;;  %v403_v0 = vld [vmem:[#allocation5 + $0x78] sm:$0xff]  ;;  %v405_v1 = vld [vmem:[#allocation5 + $0x70] sm:$0xff]  ;;  %v380_v16 = vmov 0.0   ;;  %s381_s0 = smov [#allocation7]  }
   0xd   :  { %67 = vmatpush.msra.mxu0 %v403_v0  ;;  %91 = vmatpush.msra.mxu1 %v403_v0  ;;  %v409_v2 = vld [vmem:[#allocation5 + $0x68] sm:$0xff]  ;;  %v415_v3 = vld [vmem:[#allocation5 + $0x60] sm:$0xff]  ;;  %v421_v4 = vld [vmem:[#allocation5 + $0x58] sm:$0xff]  ;;  %s263_s1 = sshll.u32 %s381_s0, 4  ;;  %s265_s23 = sshll.u32 %s568_s2, 4  ;;  %s264_s1 = int_to_ptr.vmem [resolvable:$true] %s263_s1  ;;  %s266_s23 = int_to_ptr.hbm [resolvable:$true] %s265_s23 }
   0xe   :  { %115 = vmatpush.msra.mxu2 %v403_v0  ;;  %139 = vmatpush.msra.mxu3 %v403_v0  ;;  %v427_v5 = vld [vmem:[#allocation5 + $0x50] sm:$0xff]  ;;  %v433_v6 = vld [vmem:[#allocation5 + $0x48] sm:$0xff]  ;;  %v439_v7 = vld [vmem:[#allocation5 + $0x40] sm:$0xff] }
   0xf   :  { %68 = vmatpush.msra.mxu0 %v405_v1  ;;  %92 = vmatpush.msra.mxu1 %v405_v1  ;;  %v445_v8 = vld [vmem:[#allocation5 + $0x38] sm:$0xff]  ;;  %v451_v9 = vld [vmem:[#allocation5 + $0x30] sm:$0xff]  ;;  %v457_v10 = vld [vmem:[#allocation5 + $0x28] sm:$0xff] }
  0x10   :  { %116 = vmatpush.msra.mxu2 %v405_v1  ;;  %140 = vmatpush.msra.mxu3 %v405_v1  ;;  %v463_v11 = vld [vmem:[#allocation5 + $0x20] sm:$0xff]  ;;  %v469_v12 = vld [vmem:[#allocation5 + $0x18] sm:$0xff]  ;;  %v475_v13 = vld [vmem:[#allocation5 + $0x10] sm:$0xff] }
  0x11   :  { %69 = vmatpush.msra.mxu0 %v409_v2  ;;  %93 = vmatpush.msra.mxu1 %v409_v2  ;;  %v481_v14 = vld [vmem:[#allocation5 + $0x8] sm:$0xff]  ;;  %v487_v15 = vld [vmem:[#allocation5] sm:$0xff]  ;;  %v114_v25 = vld [vmem:[#allocation2 + $0x10] sm:$0xff] }
  0x12   :  { %117 = vmatpush.msra.mxu2 %v409_v2  ;;  %141 = vmatpush.msra.mxu3 %v409_v2  ;;  %v66_v17 = vld [vmem:[#allocation2] sm:$0xff]  ;;  %v90_v21 = vld [vmem:[#allocation2 + $0x8] sm:$0xff]  ;;  %v138_v29 = vld [vmem:[#allocation2 + $0x18] sm:$0xff] }
  0x13   :  { %70 = vmatpush.msra.mxu0 %v415_v3  ;;  %94 = vmatpush.msra.mxu1 %v415_v3  ;;  %v162_v33 = vld [vmem:[#allocation2 + $0x20] sm:$0xff]  ;;  %v186_v37 = vld [vmem:[#allocation2 + $0x28] sm:$0xff]  ;;  %v210_v41 = vld [vmem:[#allocation2 + $0x30] sm:$0xff] }
  0x14   :  { %118 = vmatpush.msra.mxu2 %v415_v3  ;;  %142 = vmatpush.msra.mxu3 %v415_v3  ;;  %v234_v45 = vld [vmem:[#allocation2 + $0x38] sm:$0xff] }
  0x15   :  { %71 = vmatpush.msra.mxu0 %v421_v4  ;;  %95 = vmatpush.msra.mxu1 %v421_v4 }
  0x16   :  { %119 = vmatpush.msra.mxu2 %v421_v4  ;;  %143 = vmatpush.msra.mxu3 %v421_v4 }
  0x17   :  { %72 = vmatpush.msra.mxu0 %v427_v5  ;;  %96 = vmatpush.msra.mxu1 %v427_v5 }
  0x18   :  { %120 = vmatpush.msra.mxu2 %v427_v5  ;;  %144 = vmatpush.msra.mxu3 %v427_v5 }
  0x19   :  { %73 = vmatpush.msra.mxu0 %v433_v6  ;;  %97 = vmatpush.msra.mxu1 %v433_v6 }
  0x1a   :  { %121 = vmatpush.msra.mxu2 %v433_v6  ;;  %145 = vmatpush.msra.mxu3 %v433_v6 }
  0x1b   :  { %74 = vmatpush.msra.mxu0 %v439_v7  ;;  %98 = vmatpush.msra.mxu1 %v439_v7 }
  0x1c   :  { %122 = vmatpush.msra.mxu2 %v439_v7  ;;  %146 = vmatpush.msra.mxu3 %v439_v7 }
  0x1d   :  { %75 = vmatpush.msra.mxu0 %v445_v8  ;;  %99 = vmatpush.msra.mxu1 %v445_v8 }
  0x1e   :  { %123 = vmatpush.msra.mxu2 %v445_v8  ;;  %147 = vmatpush.msra.mxu3 %v445_v8 }
  0x1f   :  { %76 = vmatpush.msra.mxu0 %v451_v9  ;;  %100 = vmatpush.msra.mxu1 %v451_v9 }
  0x20   :  { %124 = vmatpush.msra.mxu2 %v451_v9  ;;  %148 = vmatpush.msra.mxu3 %v451_v9 }
  0x21   :  { %77 = vmatpush.msra.mxu0 %v457_v10  ;;  %101 = vmatpush.msra.mxu1 %v457_v10 }
  0x22   :  { %125 = vmatpush.msra.mxu2 %v457_v10  ;;  %149 = vmatpush.msra.mxu3 %v457_v10 }
  0x23   :  { %78 = vmatpush.msra.mxu0 %v463_v11  ;;  %102 = vmatpush.msra.mxu1 %v463_v11 }
  0x24   :  { %126 = vmatpush.msra.mxu2 %v463_v11  ;;  %150 = vmatpush.msra.mxu3 %v463_v11 }
  0x25   :  { %79 = vmatpush.msra.mxu0 %v469_v12  ;;  %103 = vmatpush.msra.mxu1 %v469_v12 }
  0x26   :  { %127 = vmatpush.msra.mxu2 %v469_v12  ;;  %151 = vmatpush.msra.mxu3 %v469_v12 }
  0x27   :  { %80 = vmatpush.msra.mxu0 %v475_v13  ;;  %104 = vmatpush.msra.mxu1 %v475_v13 }
  0x28   :  { %128 = vmatpush.msra.mxu2 %v475_v13  ;;  %152 = vmatpush.msra.mxu3 %v475_v13 }
  0x29   :  { %81 = vmatpush.msra.mxu0 %v481_v14  ;;  %105 = vmatpush.msra.mxu1 %v481_v14 }
  0x2a   :  { %129 = vmatpush.msra.mxu2 %v481_v14  ;;  %153 = vmatpush.msra.mxu3 %v481_v14 }
  0x2b   :  { %82 = vmatpush.msra.mxu0 %v487_v15  ;;  %106 = vmatpush.msra.mxu1 %v487_v15 }
  0x2c   :  { %83 = vmatmul.f32.vlgmr.msra.gmra.mxu0 %v380_v16  ;;  %130 = vmatpush.msra.mxu2 %v487_v15 }
  0x2d   :  { %154 = vmatpush.msra.mxu3 %v487_v15  ;;  %163 = vmatpush.msrb.mxu0 %v403_v0 }
  0x2e   :  { %187 = vmatpush.msrb.mxu1 %v403_v0  ;;  %211 = vmatpush.msrb.mxu2 %v403_v0 }
  0x2f   :  { %164 = vmatpush.msrb.mxu0 %v405_v1  ;;  %235 = vmatpush.msrb.mxu3 %v403_v0 }
  0x30   :  { %188 = vmatpush.msrb.mxu1 %v405_v1  ;;  %212 = vmatpush.msrb.mxu2 %v405_v1 }
  0x31   :  { %165 = vmatpush.msrb.mxu0 %v409_v2  ;;  %236 = vmatpush.msrb.mxu3 %v405_v1 }
  0x32   :  { %189 = vmatpush.msrb.mxu1 %v409_v2  ;;  %213 = vmatpush.msrb.mxu2 %v409_v2 }
  0x33   :  { %166 = vmatpush.msrb.mxu0 %v415_v3  ;;  %237 = vmatpush.msrb.mxu3 %v409_v2 }
  0x34   :  { %190 = vmatpush.msrb.mxu1 %v415_v3  ;;  %214 = vmatpush.msrb.mxu2 %v415_v3 }
  0x35   :  { %167 = vmatpush.msrb.mxu0 %v421_v4  ;;  %238 = vmatpush.msrb.mxu3 %v415_v3 }
  0x36   :  { %191 = vmatpush.msrb.mxu1 %v421_v4  ;;  %215 = vmatpush.msrb.mxu2 %v421_v4 }
  0x37   :  { %168 = vmatpush.msrb.mxu0 %v427_v5  ;;  %239 = vmatpush.msrb.mxu3 %v421_v4 }
  0x38   :  { %192 = vmatpush.msrb.mxu1 %v427_v5  ;;  %216 = vmatpush.msrb.mxu2 %v427_v5 }
  0x39   :  { %169 = vmatpush.msrb.mxu0 %v433_v6  ;;  %240 = vmatpush.msrb.mxu3 %v427_v5 }
  0x3a   :  { %193 = vmatpush.msrb.mxu1 %v433_v6  ;;  %217 = vmatpush.msrb.mxu2 %v433_v6 }
  0x3b   :  { %170 = vmatpush.msrb.mxu0 %v439_v7  ;;  %241 = vmatpush.msrb.mxu3 %v433_v6 }
  0x3c   :  { %194 = vmatpush.msrb.mxu1 %v439_v7  ;;  %218 = vmatpush.msrb.mxu2 %v439_v7 }
  0x3d   :  { %171 = vmatpush.msrb.mxu0 %v445_v8  ;;  %242 = vmatpush.msrb.mxu3 %v439_v7 }
  0x3e   :  { %195 = vmatpush.msrb.mxu1 %v445_v8  ;;  %219 = vmatpush.msrb.mxu2 %v445_v8 }
  0x3f   :  { %172 = vmatpush.msrb.mxu0 %v451_v9  ;;  %243 = vmatpush.msrb.mxu3 %v445_v8 }
  0x40   :  { %196 = vmatpush.msrb.mxu1 %v451_v9  ;;  %220 = vmatpush.msrb.mxu2 %v451_v9 }
  0x41   :  { %173 = vmatpush.msrb.mxu0 %v457_v10  ;;  %244 = vmatpush.msrb.mxu3 %v451_v9 }
  0x42   :  { %197 = vmatpush.msrb.mxu1 %v457_v10  ;;  %221 = vmatpush.msrb.mxu2 %v457_v10 }
  0x43   :  { %174 = vmatpush.msrb.mxu0 %v463_v11  ;;  %245 = vmatpush.msrb.mxu3 %v457_v10 }
  0x44   :  { %198 = vmatpush.msrb.mxu1 %v463_v11  ;;  %222 = vmatpush.msrb.mxu2 %v463_v11 }
  0x45   :  { %175 = vmatpush.msrb.mxu0 %v469_v12  ;;  %246 = vmatpush.msrb.mxu3 %v463_v11 }
  0x46   :  { %199 = vmatpush.msrb.mxu1 %v469_v12  ;;  %223 = vmatpush.msrb.mxu2 %v469_v12 }
  0x47   :  { %176 = vmatpush.msrb.mxu0 %v475_v13  ;;  %247 = vmatpush.msrb.mxu3 %v469_v12 }
  0x48   :  { %200 = vmatpush.msrb.mxu1 %v475_v13  ;;  %224 = vmatpush.msrb.mxu2 %v475_v13 }
  0x49   :  { %177 = vmatpush.msrb.mxu0 %v481_v14  ;;  %248 = vmatpush.msrb.mxu3 %v475_v13 }
  0x4a   :  { %201 = vmatpush.msrb.mxu1 %v481_v14  ;;  %225 = vmatpush.msrb.mxu2 %v481_v14 }
  0x4b   :  { %178 = vmatpush.msrb.mxu0 %v487_v15  ;;  %249 = vmatpush.msrb.mxu3 %v481_v14 }
  0x4c   :  { %202 = vmatpush.msrb.mxu1 %v487_v15  ;;  %226 = vmatpush.msrb.mxu2 %v487_v15 }
  0x4d   :  { %250 = vmatpush.msrb.mxu3 %v487_v15 }
  0xa9   :  { %v84_v18 = vpop.f32.mrf.mxu0 }
  0xaa   :  { %v87_v19 = vadd.f32 %v84_v18, %v66_v17 }
  0xac   :  { %282 = vtanh.f32 %v87_v19 }
  0xb2   :  { %v283_v20 = vpop.eup %282 }
  0xb3   :  { %107 = vmatmul.f32.vlgmr.msra.gmra.mxu1 %v283_v20 }
 0x130   :  { %v108_v22 = vpop.f32.mrf.mxu1 }
 0x131   :  { %v111_v23 = vadd.f32 %v108_v22, %v90_v21 }
 0x133   :  { %284 = vtanh.f32 %v111_v23 }
 0x139   :  { %v285_v24 = vpop.eup %284 }
 0x13a   :  { %131 = vmatmul.f32.vlgmr.msra.gmra.mxu2 %v285_v24 }
 0x1bd   :  { %v132_v26 = vpop.f32.mrf.mxu2 }
 0x1be   :  { %v135_v27 = vadd.f32 %v132_v26, %v114_v25 }
 0x1c0   :  { %286 = vtanh.f32 %v135_v27 }
 0x1c6   :  { %v287_v28 = vpop.eup %286 }
 0x1c7   :  { %155 = vmatmul.f32.vlgmr.msra.gmra.mxu3 %v287_v28 }
 0x24a   :  { %v156_v30 = vpop.f32.mrf.mxu3 }
 0x24b   :  { %v159_v31 = vadd.f32 %v156_v30, %v138_v29 }
 0x24d   :  { %288 = vtanh.f32 %v159_v31 }
 0x253   :  { %v289_v32 = vpop.eup %288 }
 0x254   :  { %179 = vmatmul.f32.vlgmr.msrb.gmra.mxu0 %v289_v32 }
 0x2d1   :  { %v180_v34 = vpop.f32.mrf.mxu0 }
 0x2d2   :  { %v183_v35 = vadd.f32 %v180_v34, %v162_v33 }
 0x2d4   :  { %290 = vtanh.f32 %v183_v35 }
 0x2da   :  { %v291_v36 = vpop.eup %290 }
 0x2db   :  { %203 = vmatmul.f32.vlgmr.msrb.gmra.mxu1 %v291_v36 }
 0x358   :  { %v204_v38 = vpop.f32.mrf.mxu1 }
 0x359   :  { %v207_v39 = vadd.f32 %v204_v38, %v186_v37 }
 0x35b   :  { %292 = vtanh.f32 %v207_v39 }
 0x361   :  { %v293_v40 = vpop.eup %292 }
 0x362   :  { %227 = vmatmul.f32.vlgmr.msrb.gmra.mxu2 %v293_v40 }
 0x3e5   :  { %v228_v42 = vpop.f32.mrf.mxu2 }
 0x3e6   :  { %v231_v43 = vadd.f32 %v228_v42, %v210_v41 }
 0x3e8   :  { %294 = vtanh.f32 %v231_v43 }
 0x3ee   :  { %v295_v44 = vpop.eup %294 }
 0x3ef   :  { %251 = vmatmul.f32.vlgmr.msrb.gmra.mxu3 %v295_v44 }
 0x472   :  { %v252_v46 = vpop.f32.mrf.mxu3 }
 0x473   :  { %v255_v47 = vadd.f32 %v252_v46, %v234_v45 }
 0x475   :  { %296 = vtanh.f32 %v255_v47 }
 0x47b   :  { %v297_v48 = vpop.eup %296 }
 0x47c   :  { %257 = vst [vmem:[#allocation7] sm:$0xff] %v297_v48 }
 0x47d   :  { %268 = dma.vmem_to_hbm [thread:$0]  %s264_s1, 128, %s266_s23, [#allocation4]  }
 0x47e   :  { %374 = dma.done.wait [#allocation4], 128  }
 0x47f   :  { %375 = vsyncadd [#allocation4], 4294967168 }
 0x480   :  { %273 = vsyncpa [#allocation3], 1 }
 0x481   :  { %274 = vsyncpa [#allocation6], 1 }
 0x482   :  { %275 = vsyncpa [#allocation4], 1 }

</bundles_post_ra>
